<compile_context>
chip_gen: v7x
topology: tpu7x:2x2x1
jax: 0.10.0
libtpu: 0.0.40
codegen_flags: <defaults>
</compile_context>

<pallas_src>
import jax
import jax.numpy as jnp
from jax.experimental import pallas as pl
from jax.experimental.pallas import tpu as pltpu


def _pair_gen_kernel(a_ref, text_ref, w2t_ref, out_ref):
    # a_ref:    (1, 1, TJ*O)   j-half of the linear, already flat over (j, o)
    # text_ref: (1, TI, D)     the TI rows of text for this i-tile
    # w2t_ref:  (D, TJ*O)      w2 replicated TJ times along columns: [d, jj*O+o] = w2[d, o]
    # out_ref:  (1, TI, TJ*O)  flat output tile: out[i_local, jj*O + o]
    c = jnp.dot(text_ref[0], w2t_ref[...],
                preferred_element_type=jnp.float32)        # (TI, TJ*O): i-half in flat layout
    out_ref[0] = a_ref[0] + c                              # broadcast (1, TJ*O) over TI rows


def _choose_tiles(L, D, O,
                  max_out_block_bytes=6 << 20,
                  max_w_block_bytes=2 << 20):
    """Pick (TI, TJ). Output block is (TI, TJ*O) f32; weight block is (D, TJ*O).

    TJ*O must be a multiple of 128 (lane-dense, unmasked stores) or TJ == L;
    TI must be a multiple of 8 (sublane) or TI == L; both must divide L.
    Blocks are budgeted so 2x(out) + 2x(weight) + small inputs stay well under the
    32 MiB scoped-VMEM limit we request (fits v5e/v6e/v7x).
    """
    tj_opts = [t for t in range(1, L + 1)
               if L % t == 0 and (t == L or (t * O) % 128 == 0)]
    tj_fit = [t for t in tj_opts if D * t * O * 4 <= max_w_block_bytes]
    tj = max(tj_fit) if tj_fit else min(tj_opts)

    ti_opts = [t for t in range(1, L + 1)
               if L % t == 0 and (t == L or t % 8 == 0)]
    ti_fit = [t for t in ti_opts if t * tj * O * 4 <= max_out_block_bytes]
    ti = max(ti_fit) if ti_fit else min(ti_opts)
    return ti, tj


def pair_generation1(text, weight):
    """text: (B, L, D) f32; weight: (O, 2*D) f32 (PyTorch nn.Linear layout)."""
    B, L, D = text.shape
    O = weight.shape[0]
    assert weight.shape[1] == 2 * D
    LO = L * O

    # Split weight (pure glue).
    w1 = jnp.transpose(weight[:, :D])   # (D, O): multiplies text[b, j, :]
    w2 = jnp.transpose(weight[:, D:])   # (D, O): multiplies text[b, i, :]

    TI, TJ = _choose_tiles(L, D, O)

    # j-dependent half, computed once (tiny: B*L*O) and flattened to the lane-dense
    # layout the kernel stores in.  a_flat[b, 0, j*O + o] = sum_d text[b,j,d] * w1[d,o]
    a_flat = (text @ w1).reshape(B, 1, LO)

    # Column-tiled w2 so the in-kernel matmul produces the flat (i, jj*O+o) block
    # directly (same (D, TJ*O) block is reused at every grid step).
    w2_tile = jnp.tile(w2, (1, TJ))                        # (D, TJ*O)

    out_flat = pl.pallas_call(
        _pair_gen_kernel,
        out_shape=jax.ShapeDtypeStruct((B, L, LO), jnp.float32),
        grid_spec=pltpu.PrefetchScalarGridSpec(
            num_scalar_prefetch=0,
            grid=(B, L // TI, L // TJ),
            in_specs=[
                pl.BlockSpec((1, 1, TJ * O), lambda b, i, j: (b, 0, j)),
                pl.BlockSpec((1, TI, D), lambda b, i, j: (b, i, 0)),
                pl.BlockSpec((D, TJ * O), lambda b, i, j: (0, 0)),
            ],
            out_specs=pl.BlockSpec((1, TI, TJ * O), lambda b, i, j: (b, i, j)),
        ),
        compiler_params=pltpu.CompilerParams(
            dimension_semantics=("parallel", "parallel", "parallel"),
            vmem_limit_bytes=32 * 1024 * 1024,
        ),
        cost_estimate=pl.CostEstimate(
            flops=4 * B * L * D * O,
            transcendentals=0,
            bytes_accessed=4 * (B * L * LO + B * L * D + B * LO + D * TJ * O),
        ),
    )(a_flat, text, w2_tile)

    # Free metadata reshape back to the PyTorch output layout.
    return out_flat.reshape(B, L, L, O)


def pair_generation1_ref(text, weight):
    """Pure-JAX reference reproducing the PyTorch forward exactly."""
    B, L, D = text.shape
    hidden_1 = jnp.broadcast_to(text[:, None, :, :], (B, L, L, D))   # [b,i,j,:] = text[b,j,:]
    hidden_2 = jnp.broadcast_to(text[:, :, None, :], (B, L, L, D))   # [b,i,j,:] = text[b,i,:]
    cat = jnp.concatenate([hidden_1, hidden_2], axis=-1)             # (B, L, L, 2D)
    return jnp.einsum("bijk,ok->bijo", cat, weight)


if __name__ == "__main__":
    B, L, D, O = 2, 8, 32, 16   # in_features=D, out_features=O

    key = jax.random.PRNGKey(0)
    k_text, k_w = jax.random.split(key)
    text = jax.random.normal(k_text, (B, L, D), dtype=jnp.float32)
    # Deterministic kaiming-uniform-ish init for weight (O, 2D); bias=False (module default).
    bound = 1.0 / jnp.sqrt(jnp.float32(2 * D))
    weight = jax.random.uniform(k_w, (O, 2 * D), dtype=jnp.float32,
                                minval=-bound, maxval=bound)

    out = jax.block_until_ready(pair_generation1(text, weight))

    ref = pair_generation1_ref(text, weight)
    assert out.shape == (B, L, L, O), out.shape
    assert jnp.allclose(out, ref, atol=1e-4, rtol=1e-4), "mismatch vs reference"

    print("KERNEL_OK")
</pallas_src>

<mosaic_0001>
module attributes {stable_mosaic.version = 11 : i64} {
  func.func @_pair_gen_kernel(%arg0: i32, %arg1: i32, %arg2: i32, %arg3: memref<1x1x128xf32, #tpu.memory_space<vmem>>, %arg4: memref<1x8x32xf32, #tpu.memory_space<vmem>>, %arg5: memref<32x128xf32, #tpu.memory_space<vmem>>, %arg6: memref<1x8x128xf32, #tpu.memory_space<vmem>>) attributes {dimension_semantics = [#tpu.dimension_semantics<parallel>, #tpu.dimension_semantics<parallel>, #tpu.dimension_semantics<parallel>], iteration_bounds = array<i64: 2, 1, 1>, scalar_prefetch = 0 : i64, scratch_operands = 0 : i64, tpu.core_type = #tpu.core_type<tc>, window_params = [{transform_indices = @transform_0, window_bounds = array<i64: 1, 1, 128>}, {transform_indices = @transform_1, window_bounds = array<i64: 1, 8, 32>}, {pipeline_mode = #tpu.pipeline_mode<synchronous>, transform_indices = @transform_2, window_bounds = array<i64: 32, 128>}, {transform_indices = @transform_3, window_bounds = array<i64: 1, 8, 128>}]} {
    %c0 = arith.constant 0 : index
    %c0_0 = arith.constant 0 : index
    %c0_1 = arith.constant 0 : index
    %0 = vector.load %arg4[%c0, %c0_0, %c0_1] : memref<1x8x32xf32, #tpu.memory_space<vmem>>, vector<1x8x32xf32>
    %1 = vector.shape_cast %0 : vector<1x8x32xf32> to vector<8x32xf32>
    %c0_2 = arith.constant 0 : index
    %c0_3 = arith.constant 0 : index
    %2 = vector.load %arg5[%c0_2, %c0_3] : memref<32x128xf32, #tpu.memory_space<vmem>>, vector<32x128xf32>
    %cst = arith.constant dense<0.000000e+00> : vector<8x128xf32>
    %3 = tpu.matmul %1, %2, %cst {dimension_numbers = #tpu.dot_dimension_numbers<[1], [0], [0], [1], [0, 0, 1, 1], [], []>} : vector<8x32xf32>, vector<32x128xf32>, vector<8x128xf32> -> vector<8x128xf32>
    %c0_4 = arith.constant 0 : index
    %c0_5 = arith.constant 0 : index
    %c0_6 = arith.constant 0 : index
    %4 = vector.load %arg3[%c0_4, %c0_5, %c0_6] : memref<1x1x128xf32, #tpu.memory_space<vmem>>, vector<1x1x128xf32>
    %5 = vector.shape_cast %4 : vector<1x1x128xf32> to vector<1x128xf32>
    %6 = vector.broadcast %5 : vector<1x128xf32> to vector<8x128xf32>
    %7 = arith.addf %6, %3 : vector<8x128xf32>
    %c0_7 = arith.constant 0 : index
    %c0_8 = arith.constant 0 : index
    %c0_9 = arith.constant 0 : index
    %8 = vector.load %arg6[%c0_7, %c0_8, %c0_9] : memref<1x8x128xf32, #tpu.memory_space<vmem>>, vector<1x8x128xf32>
    %9 = vector.shape_cast %8 : vector<1x8x128xf32> to vector<8x128xf32>
    %10 = vector.shape_cast %7 : vector<8x128xf32> to vector<1x8x128xf32>
    tpu.vector_store %arg6[%c0_7, %c0_8, %c0_9], %10 {strides = array<i32>} : memref<1x8x128xf32, #tpu.memory_space<vmem>>, vector<1x8x128xf32>,
    return
  }
  func.func @transform_0(%arg0: i32, %arg1: i32, %arg2: i32) -> (i32, i32, i32) {
    %c0_i32 = arith.constant 0 : i32
    %c0_i32_0 = arith.constant 0 : i32
    return %arg0, %c0_i32, %arg2 : i32, i32, i32
  }
  func.func @transform_1(%arg0: i32, %arg1: i32, %arg2: i32) -> (i32, i32, i32) {
    %c0_i32 = arith.constant 0 : i32
    %c0_i32_0 = arith.constant 0 : i32
    return %arg0, %arg1, %c0_i32 : i32, i32, i32
  }
  func.func @transform_2(%arg0: i32, %arg1: i32, %arg2: i32) -> (i32, i32) {
    %c0_i32 = arith.constant 0 : i32
    %c0_i32_0 = arith.constant 0 : i32
    %c0_i32_1 = arith.constant 0 : i32
    return %c0_i32, %c0_i32_0 : i32, i32
  }
  func.func @transform_3(%arg0: i32, %arg1: i32, %arg2: i32) -> (i32, i32, i32) {
    %c0_i32 = arith.constant 0 : i32
    return %arg0, %arg1, %arg2 : i32, i32, i32
  }
}

</mosaic_0001>

<bundles_post_ra>
// kernel: tpu_custom_call.1
= control target key start
LH: loop header
LB: loop body
LE: loop exit
PB: predicated region body
PF: predicated region fallthrough
CT: control target
= control target key end

     0   :  { %s1058_s0 = inlined_call_operand.hbm [shape: f32[2,1,128], index: 0, kind: input, shape index: {}]   ;;  %s1059_s1 = inlined_call_operand.hbm [shape: f32[2,8,32], index: 1, kind: input, shape index: {}]   ;;  %s1060_s2 = inlined_call_operand.hbm [shape: f32[32,128], index: 2, kind: input, shape index: {}]   ;;  %s1061_s3 = inlined_call_operand.hbm [shape: f32[2,8,128], index: 3, kind: output, shape index: {}]  }
   0x1   :  { %1066 = sst [smem:[#allocation13_spill]] %s1058_s0 }
   0x2   :  { %8 = vsyncpa [#allocation3], 0 }
   0x3   :  { %10 = vsyncpa [#allocation3 + $0x1], 0 }
   0x4   :  { %11 = vsyncpa [#allocation6], 0 }
   0x5   :  { %13 = vsyncpa [#allocation6 + $0x1], 0 }
   0x6   :  { %14 = vsyncpa [#allocation4], 0 }
   0x7   :  { %16 = vsyncpa [#allocation4 + $0x1], 0  ;;  %s813_s12 = smov 0   ;;  %s815_s13 = smov 0  }
   0x8   :  { %s817_s14 = smov 0   ;;  %s819_s15 = smov 0  }
   0x9   :  { %s821_s16 = smov 0   ;;  %s823_s17 = smov 0  }
   0xa LB: > { %s844_s18 = sadd.s32 4294967295, %s782_s17   ;;  %s482_s19 = sadd.s32 4294967294, %s782_s17   ;;  %s782_s17 = sphi %s823_s17, %s22_s17   ;;  %s778_s16 = sphi %s821_s16, %s1087_s16   ;;  %s774_s15 = sphi %s819_s15, %s1086_s15   ;;  %s770_s14 = sphi %s817_s14, %s1085_s14   ;;  %s766_s13 = sphi %s815_s13, %s1084_s13   ;;  %s762_s12 = sphi %s813_s12, %s1083_s12  }
   0xb   : > { %p63_p0 = scmp.ne.s32.totalorder %s766_s13, %s762_s12  ;;  %p1062_p1 = scmp.eq.s32.totalorder %s844_s18, 0 }
   0xc   : > { %p146_p3 = scmp.eq.s32.totalorder %s482_s19, 1  ;;  %p483_p5 = scmp.ge.s32.totalorder %s782_s17, 1 }
   0xd   : > { %p853_p4 = por %p1062_p1, %p63_p0  ;;  %p153_p7 = scmp.lt.s32.totalorder %s782_s17, 3 }
   0xe   : > { %p858_p6 = por %p146_p3, %p63_p0  ;;  %s784_s23 = smov [#allocation7]  }
   0xf   : > { %s1067_s20 = scalar_select %p853_p4, 1, 0 }
  0x10   : > { %s1068_s21 = scalar_select %p858_p6, 1, 0 }
  0x11   : > { %p863_p8 = pnand %p483_p5, %p153_p7  ;;  %s165_s24 = sshll.u32 %s784_s23, 4  ;;  %s166_s24 = int_to_ptr.vmem [resolvable:$true] %s165_s24 }
  0x12   : > { %s41_s26 = sadd.s32 1, %s778_s16  ;;  %s604_s29 = scalar_lea.hbm %s1060_s2, 512 }
  0x13   : > { %s1069_s22 = scalar_select %p863_p8, 1, 0 }
  0x14   : > { %p531_p9 = pneg %p863_p8  ;;  %p605_p12 = scmp.ne.s32.totalorder %s1060_s2, %s604_s29 }
  0x15   : > { %p611_p5 = scmp.lt.u32.totalorder %s604_s29, %s1060_s2 }
  0x16   : > { %p872_p11 = pnand %p531_p9, %p1062_p1 }
  0x18   : > { %p606_p13 = pneg %p872_p11 }
  0x1a   : > { %p607_p0 = pnand %p606_p13, %p605_p12 }
  0x1c   : > { %p608_p3 = pneg %p607_p0 }
  0x1e   : > { %p613_p7 = pnand %p611_p5, %p608_p3 }
  0x20   : > { %616 = shalt.err (!%p613_p7)
}
  0x21   : > { %s617_s7 = scalar_lea.vmem %s166_s24, 512  ;;  %p625_p2 = scmp.lt.s32.totalorder %s166_s24, %s166_s24 }
  0x22   : > { %p618_p9 = scmp.ne.s32.totalorder %s166_s24, %s617_s7  ;;  %p626_p6 = scmp.lt.s32.totalorder %s617_s7, %s617_s7 }
  0x24   : > { %p620_p10 = pnand %p618_p9, %p606_p13  ;;  %p627_p4 = por %p626_p6, %p625_p2 }
  0x26   : > { %p621_p1 = pneg %p620_p10 }
  0x28   : > { %p628_p8 = pnand %p627_p4, %p621_p1 }
  0x2a   : > { %631 = shalt.err (!%p628_p8)
}
  0x2b   : > { %s785_s8 = smov 128   ;;  %s786_s9 = smov 8  }
  0x2c   : > { %534 = dma.hbm_to_vmem [thread:$0]  (!%p872_p11), %s1060_s2, 512, %s166_s24, [#allocation6], %s785_s8, %s785_s8, %s786_s9  }
  0x2d   : > { %p43_p1 = scmp.ge.s32.totalorder %s41_s26, 2  ;;  %s50_s19 = sadd.s32 1, %s770_s14 }
  0x2e   : > { %p57_p2 = scmp.ne.s32.totalorder %s770_s14, %s766_s13  ;;  %p58_p4 = scmp.eq.s32.totalorder %s782_s17, 0 }
  0x2f   : > { %s1089_s26 = smov (%p43_p1, %s41_s26), 0  ;;  %p1071_p8 = scmp.eq.s32.totalorder %s844_s18, 1 }
  0x30   : > { %p59_p6 = por %p58_p4, %p57_p2  ;;  %s45_s27 = ssub.s32 %s778_s16, %s1089_s26 }
  0x31   : > { %p901_p10 = por %p1071_p8, %p57_p2  ;;  %p547_p12 = scmp.lt.s32.totalorder %s782_s17, 2 }
  0x32   : > { %p48_p13 = scmp.eq.s32.totalorder %s45_s27, 0  ;;  %s909_s25 = sand.u32 1, %s770_s14  }
  0x33   : > { %s1072_s23 = scalar_select %p901_p10, 1, 0 }
  0x34   : > { %s912_s24 = scalar_select %p48_p13, %s770_s14, %s50_s19  }
  0x35   : > { %s486_s28 = sshll.u32 %s778_s16, 4  ;;  %s182_s29 = scalar_lea.vmem [#allocation2], %s909_s25 }
  0x36   : > { %s190_s30 = sshll.u32 %s182_s29, 4  ;;  %s1073_s0 = sld [smem:[#allocation13_spill]]  ;;  %s921_s30 = int_to_ptr.vmem [resolvable:$true] %s190_s30 }
  0x37   : > { %p923_p11 = pnand %p547_p12, %p59_p6  ;;  %s487_s9 = sshll.u32 %s909_s25, 3 }
  0x38   : > { %s180_s10 = scalar_lea.sflag [#allocation3], %s909_s25 }
  0x39   : > { %p634_p3 = pneg %p923_p11 }
  0x3c   : > { %s919_s6 = scalar_lea.hbm %s1073_s0, %s486_s28  ;;  %s637_s28 = scalar_lea.hbm %s1073_s0, 32 }
  0x3d   : > { %s632_s11 = scalar_lea.hbm %s919_s6, 16  ;;  %p638_p9 = scmp.lt.u32.totalorder %s919_s6, %s1073_s0 }
  0x3e   : > { %p633_p0 = scmp.ne.s32.totalorder %s919_s6, %s632_s11  ;;  %p639_p1 = scmp.lt.u32.totalorder %s637_s28, %s632_s11 }
  0x3f   : > { %p641_p4 = scmp.lt.u32.totalorder %s632_s11, %s919_s6 }
  0x40   : > { %p635_p5 = pnand %p634_p3, %p633_p0  ;;  %p640_p2 = por %p639_p1, %p638_p9 }
  0x42   : > { %p636_p7 = pneg %p635_p5  ;;  %p642_p6 = por %p641_p4, %p640_p2 }
  0x44   : > { %p643_p8 = pnand %p642_p6, %p636_p7 }
  0x46   : > { %646 = shalt.err (!%p643_p8)
}
  0x47   : > { %s647_s5 = scalar_lea.vmem %s921_s30, 16  ;;  %s787_s19 = smov [#allocation2]  }
  0x48   : > { %p648_p12 = scmp.ne.s32.totalorder %s921_s30, %s647_s5  ;;  %s652_s27 = sshll.u32 %s787_s19, 4  ;;  %s653_s27 = int_to_ptr.vmem [resolvable:$false] %s652_s27 }
  0x49   : > { %s654_s29 = scalar_lea.vmem %s653_s27, 32  ;;  %p655_p5 = scmp.lt.s32.totalorder %s921_s30, %s653_s27 }
  0x4a   : > { %p650_p13 = pnand %p648_p12, %p634_p3  ;;  %p656_p9 = scmp.lt.s32.totalorder %s654_s29, %s647_s5 }
  0x4c   : > { %p651_p0 = pneg %p650_p13  ;;  %p657_p1 = por %p656_p9, %p655_p5 }
  0x4e   : > { %p658_p2 = pnand %p657_p1, %p651_p0 }
  0x50   : > { %661 = shalt.err (!%p658_p2)
}
  0x51   : > { %538 = dma.hbm_to_vmem [thread:$0]  (!%p923_p11), %s919_s6, 16, %s921_s30, %s180_s10  }
  0x52   : > { %s488_s11 = sshll.u32 %s778_s16, 7  ;;  %s201_s28 = scalar_lea.vmem [#allocation5], %s487_s9 }
  0x53   : > { %s209_s4 = sshll.u32 %s201_s28, 4  ;;  %s961_s5 = scalar_lea.hbm %s1059_s1, %s488_s11  ;;  %s210_s4 = int_to_ptr.vmem [resolvable:$true] %s209_s4 }
  0x54   : > { %s1075_s27 = sand.u32 1, %s782_s17   ;;  %s662_s0 = scalar_lea.hbm %s961_s5, 128 }
  0x55   : > { %s198_s29 = scalar_lea.sflag [#allocation6], %s1075_s27  ;;  %p663_p7 = scmp.ne.s32.totalorder %s961_s5, %s662_s0 }
  0x56   : > { %s667_s6 = scalar_lea.hbm %s1059_s1, 256  ;;  %p668_p8 = scmp.lt.u32.totalorder %s961_s5, %s1059_s1 }
  0x57   : > { %p665_p4 = pnand %p663_p7, %p634_p3  ;;  %p669_p12 = scmp.lt.u32.totalorder %s667_s6, %s662_s0 }
  0x58   : > { %p671_p0 = scmp.lt.u32.totalorder %s662_s0, %s961_s5 }
  0x59   : > { %p666_p6 = pneg %p665_p4  ;;  %p670_p13 = por %p669_p12, %p668_p8 }
  0x5b   : > { %p672_p5 = por %p671_p0, %p670_p13 }
  0x5d   : > { %p673_p9 = pnand %p672_p5, %p666_p6 }
  0x5f   : > { %676 = shalt.err (!%p673_p9)
}
  0x60   : > { %s677_s10 = scalar_lea.vmem %s210_s4, 128  ;;  %s788_s11 = smov [#allocation5]  }
  0x61   : > { %p678_p1 = scmp.ne.s32.totalorder %s210_s4, %s677_s10  ;;  %s682_s28 = sshll.u32 %s788_s11, 4  ;;  %s683_s28 = int_to_ptr.vmem [resolvable:$false] %s682_s28 }
  0x62   : > { %s684_s19 = scalar_lea.vmem %s683_s28, 256  ;;  %p685_p4 = scmp.lt.s32.totalorder %s210_s4, %s683_s28 }
  0x63   : > { %p680_p2 = pnand %p678_p1, %p634_p3  ;;  %p686_p10 = scmp.lt.s32.totalorder %s684_s19, %s677_s10 }
  0x65   : > { %p681_p7 = pneg %p680_p2  ;;  %p687_p8 = por %p686_p10, %p685_p4 }
  0x67   : > { %p688_p12 = pnand %p687_p8, %p681_p7 }
  0x69   : > { %691 = shalt.err (!%p688_p12)
}
  0x6a   : > { %541 = dma.hbm_to_vmem [thread:$0]  (!%p923_p11), %s961_s5, 128, %s210_s4, %s198_s29  }
  0x6b   : > { %p1076_p6 = scmp.ne.s32.totalorder %s1069_s22, 0 }
  0x6c   : > { %s987_s0 = sand.u32 (!%p1076_p6), 1, %s766_s13   ;;  %p1077_p3 = scmp.ne.s32.totalorder (!%p1076_p6), %s1067_s20, 0 }
  0x6d   : > { %218 = sbr.rel (%p1076_p6) target bundleno = 361 (0x169), region = 32  ;;  %s221_s27 = scalar_lea.sflag (!%p1076_p6), [#allocation3], %s987_s0 }
  0x6e   : > { %s223_s25 = scalar_lea.vmem (!%p1076_p6), [#allocation2], %s987_s0 }
  0x74   : > { %745 = dma.done.wait (%p1077_p3), %s221_s27, 16  }
  0x75   : > { %747 = vsyncadd (%p1077_p3), %s221_s27, 4294967280  ;;  %s228_s7 = sand.u32 1, %s844_s18   ;;  %s490_s4 = sshll.u32 %s987_s0, 3 }
  0x76   : > { %s229_s22 = scalar_lea.sflag [#allocation6], %s228_s7  ;;  %s232_s5 = scalar_lea.vmem [#allocation5], %s490_s4 }
  0x77   : > { %749 = dma.done.wait (%p1077_p3), %s229_s22, 128  }
  0x78   : > { %751 = vsyncadd (%p1077_p3), %s229_s22, 4294967168  ;;  %p1078_p10 = scmp.eq.s32.totalorder %s844_s18, 0 }
  0x7a   : > { %753 = dma.done.wait (%p1078_p10), [#allocation6], 512   ;;  %p1079_p11 = pmov %p1078_p10 }
  0x7b   : > { %v789_v0 = vmov 0.0|0.0   ;;  %vm790_vm0 = vmmov 0   ;;  %v791_v1 = vmov 0.0   ;;  %v264_v2 = vld [vmem:[#allocation7] sm:$0xff]  ;;  %v265_v3 = vld [vmem:[#allocation7 + $0x8] sm:$0xff]  ;;  %v266_v4 = vld [vmem:[#allocation7 + $0x10] sm:$0xff] }
  0x7c   : > { %755 = vsyncadd (%p1079_p11), [#allocation6], 4294966784  ;;  %515 = vmatprep.subr.bf16.mxu0 %v789_v0  ;;  %512 = vmatprep.mubr.msk.f32.mxu0 %vm790_vm0, %v791_v1  ;;  %v516_v5 = vpack.c.bf16 %v265_v3, %v264_v2  ;;  %v267_v6 = vld [vmem:[#allocation7 + $0x18] sm:$0xff]  ;;  %vm268_vm1 = vcmask 261120   ;;  %v494_v9 = vld [vmem:[%s223_s25] ss:$0 sm:$0xff] }
  0x7d   : > { %v519_v7 = vpack.c.bf16 %v267_v6, %v266_v4  ;;  %v263_v8 = vld [vmem:[%s232_s5] sm:$0xff]  ;;  %s496_s18 = sshll.u32 %s774_s15, 7  ;;  %s262_s20 = scalar_lea.vmem [#allocation8], %s490_s4 }
  0x7e   : > { %517 = vmatpush3.bf16.msra.mxu0 %v516_v5  ;;  %s367_s29 = sshll.u32 %s262_s20, 4  ;;  %s1009_s8 = scalar_lea.hbm %s1061_s3, %s496_s18  ;;  %s1011_s29 = int_to_ptr.vmem [resolvable:$true] %s367_s29 }
  0x7f   : > { %518 = vmatprep.subr.bf16.mxu0 %v789_v0  ;;  %s352_s9 = scalar_lea.sflag [#allocation4], %s987_s0  ;;  %s692_s10 = scalar_lea.vmem %s1011_s29, 128 }
  0x80   : > { %p693_p13 = scmp.ne.s32.totalorder %s1011_s29, %s692_s10  ;;  %p1080_p0 = scmp.ne.s32.totalorder %s1072_s23, 0 }
  0x81   : > { %s792_s15 = smov [#allocation8]  }
  0x82   : > { %520 = vmatpush3.bf16.msra.mxu0 %v519_v7  ;;  %p694_p5 = pnand %p693_p13, %p1080_p0  ;;  %s696_s11 = sshll.u32 %s792_s15, 4  ;;  %s697_s11 = int_to_ptr.vmem [resolvable:$false] %s696_s11 }
  0x83   : > { %s698_s28 = scalar_lea.vmem %s697_s11, 256  ;;  %p699_p1 = scmp.lt.s32.totalorder %s1011_s29, %s697_s11 }
  0x84   : > { %p695_p9 = pneg %p694_p5  ;;  %p700_p2 = scmp.lt.s32.totalorder %s698_s28, %s692_s10 }
  0x85   : > { %513 = vmatmul.mubr.msk.f32.vlgmr.msra.gmra.mrb[0].mxu0 %vm268_vm1, %v263_v8 }
  0x86   : > { %p701_p7 = por %p700_p2, %p699_p1 }
  0x88   : > { %p702_p4 = pnand %p701_p7, %p695_p9 }
 0x158   : > { %v338_v10 = vpop.f32.mrb[0].mxu0 }
 0x159   : > { %v349_v11 = vadd.f32 %v494_v9, %v338_v10  ;;  %v514_v12 = vpop.f32.mrb[1].mxu0 }
 0x15b   : > { %350 = vst [vmem:[%s262_s20] sm:$0xff] %v349_v11 }
 0x15c   : > { %705 = shalt.err (!%p702_p4)
}
 0x15d   : > { %s706_s19 = scalar_lea.hbm %s1009_s8, 128  ;;  %s710_s25 = scalar_lea.hbm %s1061_s3, 256 }
 0x15e   : > { %p707_p8 = scmp.ne.s32.totalorder %s1009_s8, %s706_s19  ;;  %p711_p3 = scmp.lt.u32.totalorder %s1009_s8, %s1061_s3 }
 0x15f   : > { %p712_p10 = scmp.lt.u32.totalorder %s710_s25, %s706_s19  ;;  %p714_p13 = scmp.lt.u32.totalorder %s706_s19, %s1009_s8 }
 0x160   : > { %p708_p12 = pnand %p707_p8, %p1080_p0 }
 0x161   : > { %p713_p11 = por %p712_p10, %p711_p3 }
 0x162   : > { %p709_p6 = pneg %p708_p12 }
 0x163   : > { %p715_p5 = por %p714_p13, %p713_p11 }
 0x165   : > { %p716_p9 = pnand %p715_p5, %p709_p6 }
 0x167   : > { %719 = shalt.err (!%p716_p9)
}
 0x168   : > { %529 = dma.vmem_to_hbm [thread:$0]  (%p1080_p0), %s1011_s29, 128, %s1009_s8, %s352_s9  }
 0x169 PF: > { %s379_s22 = sand.u32 1, %s762_s12   ;;  %p1081_p1 = scmp.ne.s32.totalorder %s1068_s21, 0 }
 0x16a   : > { %p1082_p2 = scmp.ge.s32.totalorder %s782_s17, 2  ;;  %s380_s5 = scalar_lea.sflag [#allocation4], %s379_s22 }
 0x16c   : > { %p543_p7 = pnand %p1082_p2, %p1081_p1 }
 0x16e   : > { %757 = dma.done.wait (!%p543_p7), %s380_s5, 128  }
 0x16f   : > { %759 = vsyncadd (!%p543_p7), %s380_s5, 4294967168  ;;  %s22_s17 = sadd.s32 1, %s782_s17   ;;  %s1083_s12 = smov %s766_s13 }
 0x170   : > { %p19_p4 = scmp.ge.s32.totalorder %s22_s17, 4   ;;  %s1084_s13 = smov %s770_s14 }
 0x171   : > { %s1085_s14 = smov %s912_s24  ;;  %s1086_s15 = smov %s778_s16 }
 0x172   : > { %s1087_s16 = smov %s1089_s26  ;;  %21 = sbr.rel (!%p19_p4) target bundleno = 10 (0xa), region = 94 }
 0x179   :  { %385 = vsyncpa [#allocation3], 1 }
 0x17a   :  { %387 = vsyncpa [#allocation3 + $0x1], 1 }
 0x17b   :  { %388 = vsyncpa [#allocation6], 1 }
 0x17c   :  { %390 = vsyncpa [#allocation6 + $0x1], 1 }
 0x17d   :  { %391 = vsyncpa [#allocation4], 1 }
 0x17e   :  { %393 = vsyncpa [#allocation4 + $0x1], 1 }

</bundles_post_ra>
